<compile_context>
chip_gen: v6e
topology: v6e:2x2x1
jax: 0.10.0
libtpu: 0.0.40
codegen_flags: <defaults>
</compile_context>

<pallas_src>
import jax
import jax.numpy as jnp
from jax.experimental import pallas as pl
from jax.experimental.pallas import tpu as pltpu


# Row tile for the streamed M = B*N axis.  512 rows keeps double-buffered
# activation/output tiles + full resident weights well under 64 MiB (v7x VMEM)
# for dim up to ~1K f32, while being big enough to amortize per-step overhead
# on v5e/v6e (measured tile-size sweet spot).
_MAX_ROW_TILE = 512
# Explicit scoped-VMEM limit: above the 16/32 MiB defaults (v5e / v6e-v7x) but
# safely below v7x's 64 MiB physical VMEM.
_VMEM_LIMIT_BYTES = 48 * 1024 * 1024


def _pick_row_tile(m):
    # block_shape second-to-last dim must be a multiple of 8 or the full extent.
    if m <= _MAX_ROW_TILE:
        return m                  # full extent — always legal
    return _MAX_ROW_TILE          # multiple of 8 and 128; partial last block is masked


# ----------------------------- fused (self-attn) path ------------------------

def _fused_proj_kernel(x_ref, w_ref, b_ref, o_ref):
    # One MXU matmul per row tile; weights/bias stay resident across grid steps.
    acc = jnp.dot(x_ref[...], w_ref[...], preferred_element_type=jnp.float32)
    o_ref[...] = (acc + b_ref[...]).astype(o_ref.dtype)


def _fused_projection(x_flat, w_cat, b_cat):
    M, K = x_flat.shape
    N = w_cat.shape[1]
    tm = _pick_row_tile(M)
    grid = (pl.cdiv(M, tm),)
    itemsize = jnp.dtype(x_flat.dtype).itemsize
    cost = pl.CostEstimate(
        flops=2 * M * K * N,
        transcendentals=0,
        bytes_accessed=(x_flat.size + w_cat.size + b_cat.size + M * N) * itemsize,
    )
    return pl.pallas_call(
        _fused_proj_kernel,
        out_shape=jax.ShapeDtypeStruct((M, N), x_flat.dtype),
        grid_spec=pltpu.PrefetchScalarGridSpec(
            num_scalar_prefetch=0,
            grid=grid,
            in_specs=[
                pl.BlockSpec((tm, K), lambda i: (i, 0)),   # streamed row tiles
                pl.BlockSpec((K, N), lambda i: (0, 0)),    # resident weights
                pl.BlockSpec((1, N), lambda i: (0, 0)),    # resident bias
            ],
            out_specs=pl.BlockSpec((tm, N), lambda i: (i, 0)),
        ),
        compiler_params=pltpu.CompilerParams(
            dimension_semantics=("parallel",),
            vmem_limit_bytes=_VMEM_LIMIT_BYTES,
        ),
        cost_estimate=cost,
    )(x_flat, w_cat, b_cat)


# --------------------------- dual (cross-attn) path ---------------------------

def _dual_proj_kernel(x_ref, kv_ref, wqkv_ref, bqkv_ref, wkv_ref, bkv_ref,
                      qkv_out_ref, kv_out_ref):
    qkv = jnp.dot(x_ref[...], wqkv_ref[...], preferred_element_type=jnp.float32)
    qkv_out_ref[...] = (qkv + bqkv_ref[...]).astype(qkv_out_ref.dtype)
    kv = jnp.dot(kv_ref[...], wkv_ref[...], preferred_element_type=jnp.float32)
    kv_out_ref[...] = (kv + bkv_ref[...]).astype(kv_out_ref.dtype)


def _dual_projection(x_flat, kv_flat, wqkv_t, bqkv, wkv_t, bkv):
    M, K = x_flat.shape
    N3 = wqkv_t.shape[1]
    N2 = wkv_t.shape[1]
    tm = _pick_row_tile(M)
    grid = (pl.cdiv(M, tm),)
    itemsize = jnp.dtype(x_flat.dtype).itemsize
    cost = pl.CostEstimate(
        flops=2 * M * K * (N3 + N2),
        transcendentals=0,
        bytes_accessed=(x_flat.size + kv_flat.size + wqkv_t.size + wkv_t.size
                        + bqkv.size + bkv.size + M * (N3 + N2)) * itemsize,
    )
    return pl.pallas_call(
        _dual_proj_kernel,
        out_shape=(
            jax.ShapeDtypeStruct((M, N3), x_flat.dtype),
            jax.ShapeDtypeStruct((M, N2), x_flat.dtype),
        ),
        grid_spec=pltpu.PrefetchScalarGridSpec(
            num_scalar_prefetch=0,
            grid=grid,
            in_specs=[
                pl.BlockSpec((tm, K), lambda i: (i, 0)),   # streamed decoder rows
                pl.BlockSpec((tm, K), lambda i: (i, 0)),   # streamed encoder rows
                pl.BlockSpec((K, N3), lambda i: (0, 0)),   # resident W_qkv
                pl.BlockSpec((1, N3), lambda i: (0, 0)),
                pl.BlockSpec((K, N2), lambda i: (0, 0)),   # resident W_kv
                pl.BlockSpec((1, N2), lambda i: (0, 0)),
            ],
            out_specs=[
                pl.BlockSpec((tm, N3), lambda i: (i, 0)),
                pl.BlockSpec((tm, N2), lambda i: (i, 0)),
            ],
        ),
        compiler_params=pltpu.CompilerParams(
            dimension_semantics=("parallel",),
            vmem_limit_bytes=_VMEM_LIMIT_BYTES,
        ),
        cost_estimate=cost,
    )(x_flat, kv_flat, wqkv_t, bqkv, wkv_t, bkv)


# ---------------------------------- module ------------------------------------

class LinearProjectionConcatKV:
    """JAX/Pallas port of LinearProjection_Concat_kv."""

    def __init__(self, dim, heads=8, dim_head=64, bias=True, key=None,
                 dtype=jnp.float32):
        inner_dim = dim_head * heads
        self.dim = dim
        self.heads = heads
        self.inner_dim = inner_dim
        if key is None:
            key = jax.random.PRNGKey(0)
        k1, k2, k3, k4 = jax.random.split(key, 4)
        bound = 1.0 / (dim ** 0.5)
        # Weights stored pre-transposed: (dim, out_features) for x @ W.
        self.wqkv_t = jax.random.uniform(k1, (dim, inner_dim * 3), dtype,
                                         minval=-bound, maxval=bound)
        self.wkv_t = jax.random.uniform(k2, (dim, inner_dim * 2), dtype,
                                        minval=-bound, maxval=bound)
        if bias:
            self.bqkv = jax.random.uniform(k3, (1, inner_dim * 3), dtype,
                                           minval=-bound, maxval=bound)
            self.bkv = jax.random.uniform(k4, (1, inner_dim * 2), dtype,
                                          minval=-bound, maxval=bound)
        else:
            self.bqkv = jnp.zeros((1, inner_dim * 3), dtype)
            self.bkv = jnp.zeros((1, inner_dim * 2), dtype)
        # Fused self-attention path: single lane-dense weight slab
        # [W_qkv | W_kv] -> columns are [q | k_d | v_d | k_e | v_e].
        self.w_cat = jnp.concatenate([self.wqkv_t, self.wkv_t], axis=1)
        self.b_cat = jnp.concatenate([self.bqkv, self.bkv], axis=1)

    def __call__(self, x, attn_kv=None):
        B_, N, C = x.shape
        head_dim = C // self.heads
        # Downstream reshape (as in the PyTorch module) requires this.
        assert self.inner_dim == self.heads * head_dim, \
            "inner_dim must equal heads * (C // heads)"

        x_flat = x.reshape(B_ * N, C)

        if attn_kv is None:
            # Self-attention: one fused matmul, activations read from HBM once.
            out = _fused_projection(x_flat, self.w_cat, self.b_cat)
            proj = out.reshape(B_, N, 5, self.heads, head_dim)
            proj = jnp.transpose(proj, (2, 0, 3, 1, 4))   # (5, B, H, N, Dh)
            q = proj[0]
            k = jnp.concatenate((proj[1], proj[3]), axis=2)
            v = jnp.concatenate((proj[2], proj[4]), axis=2)
            return q, k, v

        # Cross-attention path (attn_kv provided).
        assert attn_kv.shape == x.shape, \
            "attn_kv must match x's shape (as required by the original reshape)"
        kv_flat = attn_kv.reshape(B_ * N, C)
        qkv_flat, kv_enc_flat = _dual_projection(
            x_flat, kv_flat, self.wqkv_t, self.bqkv, self.wkv_t, self.bkv)

        qkv_dec = jnp.transpose(
            qkv_flat.reshape(B_, N, 3, self.heads, head_dim), (2, 0, 3, 1, 4))
        kv_enc = jnp.transpose(
            kv_enc_flat.reshape(B_, N, 2, self.heads, head_dim), (2, 0, 3, 1, 4))
        q, k_d, v_d = qkv_dec[0], qkv_dec[1], qkv_dec[2]
        k_e, v_e = kv_enc[0], kv_enc[1]
        k = jnp.concatenate((k_d, k_e), axis=2)
        v = jnp.concatenate((v_d, v_e), axis=2)
        return q, k, v


def _reference(x, attn_kv, mod: LinearProjectionConcatKV):
    B_, N, C = x.shape
    head_dim = C // mod.heads
    qkv = x @ mod.wqkv_t + mod.bqkv[0]
    kv = attn_kv @ mod.wkv_t + mod.bkv[0]
    qkv = jnp.transpose(qkv.reshape(B_, N, 3, mod.heads, head_dim), (2, 0, 3, 1, 4))
    kv = jnp.transpose(kv.reshape(B_, N, 2, mod.heads, head_dim), (2, 0, 3, 1, 4))
    q, k_d, v_d = qkv[0], qkv[1], qkv[2]
    k_e, v_e = kv[0], kv[1]
    return q, jnp.concatenate((k_d, k_e), 2), jnp.concatenate((v_d, v_e), 2)


if __name__ == "__main__":
    # Shapes: the module's reshape requires inner_dim == C, so dim_head = dim/heads.
    B, N, dim, heads = 2, 8, 32, 4
    dim_head = dim // heads

    key = jax.random.PRNGKey(0)
    kx, kkv, kp = jax.random.split(key, 3)
    x = jax.random.normal(kx, (B, N, dim), jnp.float32)
    x2 = jax.random.normal(kkv, (B, N, dim), jnp.float32)

    mod = LinearProjectionConcatKV(dim, heads=heads, dim_head=dim_head,
                                   bias=True, key=kp)

    # Fused self-attention path (attn_kv defaults to x).
    q, k, v = mod(x)
    jax.block_until_ready((q, k, v))
    q_r, k_r, v_r = _reference(x, x, mod)
    assert q.shape == (B, heads, N, dim_head)
    assert k.shape == (B, heads, 2 * N, dim_head)
    assert v.shape == (B, heads, 2 * N, dim_head)
    assert jnp.allclose(q, q_r, atol=1e-5)
    assert jnp.allclose(k, k_r, atol=1e-5)
    assert jnp.allclose(v, v_r, atol=1e-5)

    # Cross-attention (dual-matmul) path.
    q2, k2, v2 = mod(x, attn_kv=x2)
    jax.block_until_ready((q2, k2, v2))
    q2_r, k2_r, v2_r = _reference(x, x2, mod)
    assert jnp.allclose(q2, q2_r, atol=1e-5)
    assert jnp.allclose(k2, k2_r, atol=1e-5)
    assert jnp.allclose(v2, v2_r, atol=1e-5)

    print("KERNEL_OK")
</pallas_src>

<mosaic_0001>
module attributes {stable_mosaic.version = 11 : i64} {
  func.func @_fused_proj_kernel(%arg0: i32, %arg1: memref<16x32xf32, #tpu.memory_space<vmem>>, %arg2: memref<32x160xf32, #tpu.memory_space<vmem>>, %arg3: memref<1x160xf32, #tpu.memory_space<vmem>>, %arg4: memref<16x160xf32, #tpu.memory_space<vmem>>) attributes {dimension_semantics = [#tpu.dimension_semantics<parallel>], iteration_bounds = array<i64: 1>, scalar_prefetch = 0 : i64, scratch_operands = 0 : i64, tpu.core_type = #tpu.core_type<tc>, window_params = [{transform_indices = @transform_0, window_bounds = array<i64: 16, 32>}, {pipeline_mode = #tpu.pipeline_mode<synchronous>, transform_indices = @transform_1, window_bounds = array<i64: 32, 160>}, {pipeline_mode = #tpu.pipeline_mode<synchronous>, transform_indices = @transform_2, window_bounds = array<i64: 1, 160>}, {transform_indices = @transform_3, window_bounds = array<i64: 16, 160>}]} {
    %c0 = arith.constant 0 : index
    %c0_0 = arith.constant 0 : index
    %0 = vector.load %arg1[%c0, %c0_0] : memref<16x32xf32, #tpu.memory_space<vmem>>, vector<16x32xf32>
    %c0_1 = arith.constant 0 : index
    %c0_2 = arith.constant 0 : index
    %1 = vector.load %arg2[%c0_1, %c0_2] : memref<32x160xf32, #tpu.memory_space<vmem>>, vector<32x160xf32>
    %cst = arith.constant dense<0.000000e+00> : vector<16x160xf32>
    %2 = tpu.matmul %0, %1, %cst {dimension_numbers = #tpu.dot_dimension_numbers<[1], [0], [0], [1], [0, 0, 1, 1], [], []>} : vector<16x32xf32>, vector<32x160xf32>, vector<16x160xf32> -> vector<16x160xf32>
    %c0_3 = arith.constant 0 : index
    %c0_4 = arith.constant 0 : index
    %3 = vector.load %arg3[%c0_3, %c0_4] : memref<1x160xf32, #tpu.memory_space<vmem>>, vector<1x160xf32>
    %4 = vector.broadcast %3 : vector<1x160xf32> to vector<16x160xf32>
    %5 = arith.addf %2, %4 : vector<16x160xf32>
    %c0_5 = arith.constant 0 : index
    %c0_6 = arith.constant 0 : index
    %6 = vector.load %arg4[%c0_5, %c0_6] : memref<16x160xf32, #tpu.memory_space<vmem>>, vector<16x160xf32>
    tpu.vector_store %arg4[%c0_5, %c0_6], %5 {strides = array<i32>} : memref<16x160xf32, #tpu.memory_space<vmem>>, vector<16x160xf32>,
    return
  }
  func.func @transform_0(%arg0: i32) -> (i32, i32) {
    %c0_i32 = arith.constant 0 : i32
    %c0_i32_0 = arith.constant 0 : i32
    return %arg0, %c0_i32 : i32, i32
  }
  func.func @transform_1(%arg0: i32) -> (i32, i32) {
    %c0_i32 = arith.constant 0 : i32
    %c0_i32_0 = arith.constant 0 : i32
    %c0_i32_1 = arith.constant 0 : i32
    return %c0_i32, %c0_i32_0 : i32, i32
  }
  func.func @transform_2(%arg0: i32) -> (i32, i32) {
    %c0_i32 = arith.constant 0 : i32
    %c0_i32_0 = arith.constant 0 : i32
    %c0_i32_1 = arith.constant 0 : i32
    return %c0_i32, %c0_i32_0 : i32, i32
  }
  func.func @transform_3(%arg0: i32) -> (i32, i32) {
    %c0_i32 = arith.constant 0 : i32
    %c0_i32_0 = arith.constant 0 : i32
    return %arg0, %c0_i32 : i32, i32
  }
}

</mosaic_0001>

<bundles_post_ra>
// kernel: tpu_custom_call.1
= control target key start
LH: loop header
LB: loop body
LE: loop exit
PB: predicated region body
PF: predicated region fallthrough
CT: control target
= control target key end

     0   :  { %8 = vsyncpa [#allocation3], 0  ;;  %s305_s0 = inlined_call_operand.hbm [shape: f32[16,32], index: 0, kind: input, shape index: {}]   ;;  %s306_s1 = inlined_call_operand.hbm [shape: f32[32,160], index: 1, kind: input, shape index: {}]   ;;  %s307_s2 = inlined_call_operand.vmem [shape: f32[1,160], index: 2, kind: input, shape index: {}]   ;;  %s308_s3 = inlined_call_operand.hbm [shape: f32[16,160], index: 3, kind: output, shape index: {}]  }
   0x1   :  { %9 = vsyncpa [#allocation6], 0 }
   0x2   :  { %10 = vsyncpa [#allocation4], 0  ;;  %s255_s12 = smov [#allocation2]  }
   0x3   :  { %s16_s13 = sshll.u32 %s255_s12, 4  ;;  %s17_s13 = int_to_ptr.vmem [resolvable:$true] %s16_s13 }
   0x4   :  { %s197_s14 = scalar_lea.vmem %s17_s13, 256  ;;  %p202_p1 = scmp.lt.s32.totalorder %s17_s13, %s17_s13 }
   0x5   :  { %p198_p0 = scmp.ne.s32.totalorder %s17_s13, %s197_s14  ;;  %p203_p2 = scmp.lt.s32.totalorder %s197_s14, %s197_s14 }
   0x7   :  { %p204_p3 = por %p203_p2, %p202_p1 }
   0x9   :  { %p205_p4 = pnand %p204_p3, %p198_p0 }
   0xb   :  { %208 = shalt.err (!%p205_p4)
}
   0xc   :  { %s256_s15 = smov 128   ;;  %s257_s16 = smov 8  }
   0xd   :  { %22 = dma.hbm_to_vmem [thread:$0]  %s305_s0, 256, %s17_s13, [#allocation3], %s256_s15, %s256_s15, %s257_s16  }
   0xe   :  { %s258_s19 = smov [#allocation5]  }
   0xf   :  { %s28_s20 = sshll.u32 %s258_s19, 4  ;;  %s29_s20 = int_to_ptr.vmem [resolvable:$true] %s28_s20 }
  0x10   :  { %s217_s21 = scalar_lea.vmem %s29_s20, 1024  ;;  %p222_p6 = scmp.lt.s32.totalorder %s29_s20, %s29_s20 }
  0x11   :  { %p218_p5 = scmp.ne.s32.totalorder %s29_s20, %s217_s21  ;;  %p223_p7 = scmp.lt.s32.totalorder %s217_s21, %s217_s21 }
  0x13   :  { %p224_p8 = por %p223_p7, %p222_p6 }
  0x15   :  { %p225_p9 = pnand %p224_p8, %p218_p5 }
  0x17   :  { %228 = shalt.err (!%p225_p9)
}
  0x18   :  { %s259_s22 = smov 256   ;;  %s260_s23 = smov 16  }
  0x19   :  { %34 = dma.hbm_to_vmem [thread:$0]  %s306_s1, 1024, %s29_s20, [#allocation6], %s259_s22, %s259_s22, %s260_s23  }
  0x1a   :  { %249 = dma.done.wait [#allocation3], 256  }
  0x1b   :  { %250 = vsyncadd [#allocation3], 4294967040 }
  0x1c   :  { %251 = dma.done.wait [#allocation6], 1024  }
  0x1d   :  { %252 = vsyncadd [#allocation6], 4294966272  ;;  %v261_v0 = vmov 0.0   ;;  %v52_v1 = vld [vmem:[#allocation5 + $0x38] sm:$0xff]  ;;  %v51_v2 = vld [vmem:[#allocation5 + $0x30] sm:$0xff]  ;;  %vm65_vm0 = vcmask 261120   ;;  %v55_v11 = vlaneseq }
  0x1e   :  { %136 = vmatprep.mubr.f32.mxu0 %v261_v0  ;;  %142 = vmatprep.mubr.f32.mxu1 %v261_v0  ;;  %v50_v3 = vld [vmem:[#allocation5 + $0x28] sm:$0xff]  ;;  %v49_v4 = vld [vmem:[#allocation5 + $0x20] sm:$0xff]  ;;  %v48_v5 = vld [vmem:[#allocation5 + $0x18] sm:$0xff]  ;;  %s262_s26 = smov [#allocation7]  }
  0x1f   :  { %96 = vmatprep.subr.mxu0 %v52_v1  ;;  %173 = vmatprep.subr.mxu1 %v52_v1  ;;  %v47_v6 = vld [vmem:[#allocation5 + $0x10] sm:$0xff]  ;;  %v46_v7 = vld [vmem:[#allocation5 + $0x8] sm:$0xff]  ;;  %v45_v8 = vld [vmem:[#allocation5] sm:$0xff]  ;;  %v56_v12 = vshrl.u32 %v55_v11, 7  ;;  %s158_s27 = sshll.u32 %s262_s26, 4  ;;  %s159_s27 = int_to_ptr.vmem [resolvable:$true] %s158_s27 }
  0x20   :  { %97 = vmatpush1.msra.mxu0 %v51_v2  ;;  %177 = vmatpush1.msra.mxu1 %v51_v2  ;;  %v43_v9 = vld [vmem:[#allocation2] sm:$0xff]  ;;  %v44_v10 = vld [vmem:[#allocation2 + $0x8] sm:$0xff]  ;;  %p234_p11 = scmp.lt.s32.totalorder %s159_s27, %s159_s27 }
  0x21   :  { %98 = vmatprep.subr.mxu0 %v50_v3  ;;  %174 = vmatprep.subr.mxu1 %v50_v3  ;;  %v57_v13 = vsub.s32 0, %v56_v12  ;;  %v53_v14 = vld [vmem:[%s307_s2] sm:$0x3]  ;;  %v61_v15 = vsub.s32 1, %v56_v12  ;;  %s229_s2 = scalar_lea.vmem %s159_s27, 512 }
  0x22   :  { %99 = vmatpush1.msra.mxu0 %v49_v4  ;;  %178 = vmatpush1.msra.mxu1 %v49_v4  ;;  %p230_p10 = scmp.ne.s32.totalorder %s159_s27, %s229_s2  ;;  %p235_p12 = scmp.lt.s32.totalorder %s229_s2, %s229_s2 }
  0x23   :  { %100 = vmatprep.subr.mxu0 %v48_v5  ;;  %175 = vmatprep.subr.mxu1 %v48_v5  ;;  %v58_v16 = vrot.slane %v53_v14, %v57_v13  ;;  %v62_v17 = vrot.slane %v53_v14, %v61_v15 }
  0x24   :  { %101 = vmatpush1.msra.mxu0 %v47_v6  ;;  %179 = vmatpush1.msra.mxu1 %v47_v6  ;;  %p236_p13 = por %p235_p12, %p234_p11 }
  0x25   :  { %102 = vmatprep.subr.mxu0 %v46_v7  ;;  %176 = vmatprep.subr.mxu1 %v46_v7 }
  0x26   :  { %103 = vmatpush1.msra.mxu0 %v45_v8  ;;  %180 = vmatpush1.msra.mxu1 %v45_v8  ;;  %p237_p0 = pnand %p236_p13, %p230_p10 }
  0x27   :  { %171 = vmatmul.mubr.msk.f32.vlgmr.msra.gmra.mxu0 %vm65_vm0, %v43_v9  ;;  %172 = vmatmul.mubr.msk.f32.vlgmr.msra.gmra.mxu1 %vm65_vm0, %v44_v10 }
  0xe7   :  { %v138_v18 = vpop.f32.mrf.mxu0  ;;  %v144_v19 = vpop.f32.mrf.mxu1 }
  0xe8   :  { %v139_v20 = vadd.f32 %v138_v18, %v58_v16  ;;  %v145_v21 = vadd.f32 %v144_v19, %v58_v16 }
  0xe9   :  { %v140_v22 = vpop.f32.mrf.mxu0  ;;  %v146_v23 = vpop.f32.mrf.mxu1 }
  0xea   :  { %149 = vst [vmem:[#allocation7] sm:$0xff] %v139_v20  ;;  %151 = vst [vmem:[#allocation7 + $0x10] sm:$0xff] %v145_v21  ;;  %v141_v24 = vadd.f32 %v140_v22, %v62_v17  ;;  %v147_v25 = vadd.f32 %v146_v23, %v62_v17 }
  0xec   :  { %150 = vst.msk [vmem:[#allocation7 + $0x8] sm:$0xff] %vm65_vm0, %v141_v24  ;;  %152 = vst.msk [vmem:[#allocation7 + $0x18] sm:$0xff] %vm65_vm0, %v147_v25 }
  0xed   :  { %240 = shalt.err (!%p237_p0)
}
  0xee   :  { %164 = dma.vmem_to_hbm [thread:$0]  %s159_s27, 512, %s308_s3, [#allocation4], %s259_s22, %s259_s22, %s260_s23  }
  0xef   :  { %253 = dma.done.wait [#allocation4], 512  }
  0xf0   :  { %254 = vsyncadd [#allocation4], 4294966784 }
  0xf1   :  { %168 = vsyncpa [#allocation3], 1 }
  0xf2   :  { %169 = vsyncpa [#allocation6], 1 }
  0xf3   :  { %170 = vsyncpa [#allocation4], 1 }

</bundles_post_ra>
